<compile_context>
chip_gen: v7x
topology: tpu7x:2x2x1
jax: 0.10.0
libtpu: 0.0.40
codegen_flags: <defaults>
</compile_context>

<pallas_src>
import functools

import jax
import jax.numpy as jnp
from jax import lax
from jax.experimental import pallas as pl
from jax.experimental.pallas import tpu as pltpu


def _round_up(a, b):
    return ((a + b - 1) // b) * b


def _conv_gemm_kernel(x_ref, w_ref, b_ref, o_ref, *, tk, n_k):
    """Grid = (M_blocks, K_blocks).  o_ref is the resident f32 accumulator."""
    k = pl.program_id(1)

    @pl.when(k == 0)
    def _init():
        # Initialize the accumulator with the bias (lane-dense, padded Cout).
        o_ref[...] = jnp.broadcast_to(b_ref[...], o_ref.shape)

    if n_k == 1:
        # Whole contraction in one shot; weight block == full weight matrix.
        w_blk = w_ref[...]
    else:
        # Weight matrix is fully resident; slice the current K tile in VMEM.
        k0 = pl.multiple_of(k * tk, tk)
        w_blk = w_ref[pl.ds(k0, tk), :]

    o_ref[...] += jnp.dot(x_ref[...], w_blk, preferred_element_type=jnp.float32)


def para_conv3d_forward(x, weight, bias, stride=(1, 1, 1), *,
                        tm_max=512, compute_dtype=None):
    """x: (N, Cin, D, H, W), weight: (Cout, Cin, KD, KH, KW), bias: (Cout,)."""
    N, Cin, D, H, W = x.shape
    Cout, _, KD, KH, KW = weight.shape
    sd, sh, sw = stride
    OD = (D - KD) // sd + 1
    OH = (H - KH) // sh + 1
    OW = (W - KW) // sw + 1
    M = N * OD * OH * OW
    T = KD * KH * KW
    K = T * Cin

    if compute_dtype is None:
        compute_dtype = x.dtype

    # --- layout glue (pure JAX): NCDHW -> NDHWC, im2col with the taps folded
    #     into the contraction dimension: patches (M, T*Cin). ---
    x_ndhwc = jnp.transpose(x, (0, 2, 3, 4, 1)).astype(compute_dtype)
    taps = []
    for zd in range(KD):
        for zh in range(KH):
            for zw in range(KW):
                sl = x_ndhwc[:,
                             zd: zd + (OD - 1) * sd + 1: sd,
                             zh: zh + (OH - 1) * sh + 1: sh,
                             zw: zw + (OW - 1) * sw + 1: sw,
                             :]
                taps.append(sl)                       # (N, OD, OH, OW, Cin)
    patches = jnp.stack(taps, axis=4)                 # (N, OD, OH, OW, T, Cin)
    patches = patches.reshape(M, K)                   # K index = t*Cin + ci

    # weights: (Cout, Cin, KD, KH, KW) -> (KD, KH, KW, Cin, Cout) -> (K, Cout)
    w_mat = jnp.transpose(weight, (2, 3, 4, 1, 0)).reshape(K, Cout)
    w_mat = w_mat.astype(compute_dtype)

    # --- pad to MXU / lane friendly shapes ---
    Cout_pad = _round_up(Cout, 128)          # lane-dense output stores
    K_pad = _round_up(K, 128)
    if K_pad <= 1024:
        tk = K_pad                           # whole contraction per step
    else:
        tk = 512
        K_pad = _round_up(K_pad, tk)
    n_k = K_pad // tk

    # Large M tile, but keep >= 2 M blocks when M allows (v7x megacore).
    tm = min(tm_max, max(128, _round_up(pl.cdiv(M, 2), 8)))
    M_pad = _round_up(M, tm)

    patches = jnp.pad(patches, ((0, M_pad - M), (0, K_pad - K)))
    w_mat = jnp.pad(w_mat, ((0, K_pad - K), (0, Cout_pad - Cout)))
    b_mat = jnp.pad(bias.astype(jnp.float32),
                    (0, Cout_pad - Cout)).reshape(1, Cout_pad)

    grid = (M_pad // tm, n_k)
    kernel = functools.partial(_conv_gemm_kernel, tk=tk, n_k=n_k)

    out = pl.pallas_call(
        kernel,
        out_shape=jax.ShapeDtypeStruct((M_pad, Cout_pad), jnp.float32),
        grid_spec=pltpu.PrefetchScalarGridSpec(
            num_scalar_prefetch=0,
            grid=grid,
            in_specs=[
                # activation patches: one (tm, tk) tile per grid step
                pl.BlockSpec((tm, tk), lambda m, k: (m, k)),
                # full weight matrix: constant index -> DMA'd once, resident
                pl.BlockSpec((K_pad, Cout_pad), lambda m, k: (0, 0)),
                # bias row: resident
                pl.BlockSpec((1, Cout_pad), lambda m, k: (0, 0)),
            ],
            # same output block across k -> f32 accumulator resident in VMEM
            out_specs=pl.BlockSpec((tm, Cout_pad), lambda m, k: (m, 0)),
        ),
        compiler_params=pltpu.CompilerParams(
            dimension_semantics=("parallel", "arbitrary")),
    )(patches, w_mat, b_mat)

    out = out[:M, :Cout].astype(x.dtype)
    out = out.reshape(N, OD, OH, OW, Cout)
    return jnp.transpose(out, (0, 4, 1, 2, 3))        # back to NCDHW


if __name__ == "__main__":
    # Small ParaConv3D config (para_deg=1):
    # Conv3d(4 -> 8, k=(3,3,3), s=(1,1,1), bias=True), NCDHW input.
    N, Cin, Cout = 2, 4, 8
    D = H = W = 8
    KD = KH = KW = 3
    stride = (1, 1, 1)

    key = jax.random.PRNGKey(0)
    k_w, k_b, k_x = jax.random.split(key, 3)
    fan_in = Cin * KD * KH * KW
    bound = 1.0 / (fan_in ** 0.5)   # matches nn.Conv3d default init range
    weight = jax.random.uniform(k_w, (Cout, Cin, KD, KH, KW),
                                jnp.float32, -bound, bound)
    bias = jax.random.uniform(k_b, (Cout,), jnp.float32, -bound, bound)
    x = jax.random.normal(k_x, (N, Cin, D, H, W), jnp.float32)

    out = para_conv3d_forward(x, weight, bias, stride=stride)
    out = jax.block_until_ready(out)

    # Reference: plain conv3d (padding=0) — identical to ParaConv3D forward.
    ref = lax.conv_general_dilated(
        x, weight, window_strides=stride, padding="VALID",
        dimension_numbers=("NCDHW", "OIDHW", "NCDHW"))
    ref = ref + bias.reshape(1, Cout, 1, 1, 1)

    assert out.shape == ref.shape, (out.shape, ref.shape)
    assert jnp.allclose(out, ref, atol=1e-4, rtol=1e-4), float(
        jnp.max(jnp.abs(out - ref)))

    print("KERNEL_OK")
</pallas_src>

<mosaic_0001>
module attributes {stable_mosaic.version = 11 : i64} {
  func.func @_conv_gemm_kernel(%arg0: i32, %arg1: i32, %arg2: memref<216x128xf32, #tpu.memory_space<vmem>>, %arg3: memref<128x128xf32, #tpu.memory_space<vmem>>, %arg4: memref<1x128xf32, #tpu.memory_space<vmem>>, %arg5: memref<216x128xf32, #tpu.memory_space<vmem>>) attributes {dimension_semantics = [#tpu.dimension_semantics<parallel>, #tpu.dimension_semantics<arbitrary>], iteration_bounds = array<i64: 2, 1>, scalar_prefetch = 0 : i64, scratch_operands = 0 : i64, tpu.core_type = #tpu.core_type<tc>, window_params = [{transform_indices = @transform_0, window_bounds = array<i64: 216, 128>}, {pipeline_mode = #tpu.pipeline_mode<synchronous>, transform_indices = @transform_1, window_bounds = array<i64: 128, 128>}, {pipeline_mode = #tpu.pipeline_mode<synchronous>, transform_indices = @transform_2, window_bounds = array<i64: 1, 128>}, {transform_indices = @transform_3, window_bounds = array<i64: 216, 128>}]} {
    %c0_i32 = arith.constant 0 : i32
    %0 = arith.cmpi eq, %arg1, %c0_i32 : i32
    %1 = arith.extui %0 : i1 to i32
    %c0_i32_0 = arith.constant 0 : i32
    %2 = arith.cmpi ne, %1, %c0_i32_0 : i32
    scf.if %2 {
      %c0_8 = arith.constant 0 : index
      %c0_9 = arith.constant 0 : index
      %9 = vector.load %arg4[%c0_8, %c0_9] : memref<1x128xf32, #tpu.memory_space<vmem>>, vector<1x128xf32>
      %10 = vector.shape_cast %9 : vector<1x128xf32> to vector<1x128xf32>
      %11 = vector.broadcast %10 : vector<1x128xf32> to vector<216x128xf32>
      %c0_10 = arith.constant 0 : index
      %c0_11 = arith.constant 0 : index
      %12 = vector.load %arg5[%c0_10, %c0_11] : memref<216x128xf32, #tpu.memory_space<vmem>>, vector<216x128xf32>
      tpu.vector_store %arg5[%c0_10, %c0_11], %11 {strides = array<i32>} : memref<216x128xf32, #tpu.memory_space<vmem>>, vector<216x128xf32>,
    } else {
    }
    %c0 = arith.constant 0 : index
    %c0_1 = arith.constant 0 : index
    %3 = vector.load %arg3[%c0, %c0_1] : memref<128x128xf32, #tpu.memory_space<vmem>>, vector<128x128xf32>
    %c0_2 = arith.constant 0 : index
    %c0_3 = arith.constant 0 : index
    %4 = vector.load %arg5[%c0_2, %c0_3] : memref<216x128xf32, #tpu.memory_space<vmem>>, vector<216x128xf32>
    %c0_4 = arith.constant 0 : index
    %c0_5 = arith.constant 0 : index
    %5 = vector.load %arg2[%c0_4, %c0_5] : memref<216x128xf32, #tpu.memory_space<vmem>>, vector<216x128xf32>
    %cst = arith.constant dense<0.000000e+00> : vector<216x128xf32>
    %6 = tpu.matmul %5, %3, %cst {dimension_numbers = #tpu.dot_dimension_numbers<[1], [0], [0], [1], [0, 0, 1, 1], [], []>} : vector<216x128xf32>, vector<128x128xf32>, vector<216x128xf32> -> vector<216x128xf32>
    %7 = arith.addf %4, %6 : vector<216x128xf32>
    %c0_6 = arith.constant 0 : index
    %c0_7 = arith.constant 0 : index
    %8 = vector.load %arg5[%c0_6, %c0_7] : memref<216x128xf32, #tpu.memory_space<vmem>>, vector<216x128xf32>
    tpu.vector_store %arg5[%c0_6, %c0_7], %7 {strides = array<i32>} : memref<216x128xf32, #tpu.memory_space<vmem>>, vector<216x128xf32>,
    return
  }
  func.func @transform_0(%arg0: i32, %arg1: i32) -> (i32, i32) {
    %c0_i32 = arith.constant 0 : i32
    return %arg0, %arg1 : i32, i32
  }
  func.func @transform_1(%arg0: i32, %arg1: i32) -> (i32, i32) {
    %c0_i32 = arith.constant 0 : i32
    %c0_i32_0 = arith.constant 0 : i32
    %c0_i32_1 = arith.constant 0 : i32
    return %c0_i32, %c0_i32_0 : i32, i32
  }
  func.func @transform_2(%arg0: i32, %arg1: i32) -> (i32, i32) {
    %c0_i32 = arith.constant 0 : i32
    %c0_i32_0 = arith.constant 0 : i32
    %c0_i32_1 = arith.constant 0 : i32
    return %c0_i32, %c0_i32_0 : i32, i32
  }
  func.func @transform_3(%arg0: i32, %arg1: i32) -> (i32, i32) {
    %c0_i32 = arith.constant 0 : i32
    %c0_i32_0 = arith.constant 0 : i32
    return %arg0, %c0_i32 : i32, i32
  }
}

</mosaic_0001>

<bundles_post_ra>
// kernel: tpu_custom_call.1
= control target key start
LH: loop header
LB: loop body
LE: loop exit
PB: predicated region body
PF: predicated region fallthrough
CT: control target
= control target key end

     0   :  { %8 = vsyncpa [#allocation3], 0  ;;  %s1526_s0 = inlined_call_operand.hbm [shape: f32[432,128], index: 0, kind: input, shape index: {}]   ;;  %s1527_s1 = inlined_call_operand.hbm [shape: f32[128,128], index: 1, kind: input, shape index: {}]   ;;  %s1528_s2 = inlined_call_operand.vmem [shape: f32[1,128], index: 2, kind: input, shape index: {}]   ;;  %s1529_s3 = inlined_call_operand.hbm [shape: f32[432,128], index: 3, kind: output, shape index: {}]  }
   0x1   :  { %10 = vsyncpa [#allocation3 + $0x1], 0 }
   0x2   :  { %11 = vsyncpa [#allocation6], 0 }
   0x3   :  { %12 = vsyncpa [#allocation4], 0 }
   0x4   :  { %14 = vsyncpa [#allocation4 + $0x1], 0  ;;  %s1158_s12 = smov 0   ;;  %s1160_s13 = smov 0  }
   0x5   :  { %s1162_s14 = smov 0   ;;  %s1164_s15 = smov 0  }
   0x6   :  { %s1166_s16 = smov 0   ;;  %s1168_s17 = smov 0  }
   0x7 LB: > { %s690_s18 = sadd.s32 4294967295, %s1126_s17   ;;  %s691_s19 = sadd.s32 4294967294, %s1126_s17   ;;  %s1126_s17 = sphi %s1168_s17, %s20_s17   ;;  %s1122_s16 = sphi %s1166_s16, %s1552_s16   ;;  %s1118_s15 = sphi %s1164_s15, %s1551_s15   ;;  %s1114_s14 = sphi %s1162_s14, %s1550_s14   ;;  %s1110_s13 = sphi %s1160_s13, %s1549_s13   ;;  %s1106_s12 = sphi %s1158_s12, %s1548_s12  }
   0x8   : > { %p54_p0 = scmp.ne.s32.totalorder %s1110_s13, %s1106_s12  ;;  %p1192_p1 = scmp.eq.s32.totalorder %s690_s18, 0 }
   0x9   : > { %p1196_p2 = scmp.eq.s32.totalorder %s690_s18, 1  ;;  %p126_p3 = scmp.eq.s32.totalorder %s691_s19, 1 }
   0xa   : > { %s1534_s20 = scalar_select %p1192_p1, 1, 0 }
   0xb   : > { %s1535_s21 = scalar_select %p1196_p2, 1, 0 }
   0xc   : > { %p1202_p4 = por %p1192_p1, %p54_p0  ;;  %p692_p5 = scmp.ge.s32.totalorder %s1126_s17, 1 }
   0xd   : > { %p1207_p6 = por %p126_p3, %p54_p0  ;;  %p133_p7 = scmp.lt.s32.totalorder %s1126_s17, 3 }
   0xe   : > { %s1536_s22 = scalar_select %p1202_p4, 1, 0 }
   0xf   : > { %s1537_s23 = scalar_select %p1207_p6, 1, 0 }
  0x10   : > { %p1212_p8 = pnand %p692_p5, %p133_p7  ;;  %s1128_s25 = smov [#allocation5]  }
  0x11   : > { %s145_s26 = sshll.u32 %s1128_s25, 4  ;;  %s32_s28 = sadd.s32 1, %s1122_s16  ;;  %s146_s26 = int_to_ptr.vmem [resolvable:$true] %s145_s26 }
  0x12   : > { %s1538_s24 = scalar_select %p1212_p8, 1, 0 }
  0x13   : > { %p910_p9 = pneg %p1212_p8  ;;  %s982_s4 = scalar_lea.hbm %s1527_s1, 2048 }
  0x14   : > { %p983_p12 = scmp.ne.s32.totalorder %s1527_s1, %s982_s4  ;;  %p989_p5 = scmp.lt.u32.totalorder %s982_s4, %s1527_s1 }
  0x15   : > { %p1221_p11 = pnand %p910_p9, %p1192_p1 }
  0x17   : > { %p984_p13 = pneg %p1221_p11 }
  0x19   : > { %p985_p0 = pnand %p984_p13, %p983_p12 }
  0x1b   : > { %p986_p3 = pneg %p985_p0 }
  0x1d   : > { %p991_p7 = pnand %p989_p5, %p986_p3 }
  0x1f   : > { %994 = shalt.err (!%p991_p7)
}
  0x20   : > { %s995_s9 = scalar_lea.vmem %s146_s26, 2048  ;;  %p1003_p1 = scmp.lt.s32.totalorder %s146_s26, %s146_s26 }
  0x21   : > { %p996_p9 = scmp.ne.s32.totalorder %s146_s26, %s995_s9  ;;  %p1004_p4 = scmp.lt.s32.totalorder %s995_s9, %s995_s9 }
  0x23   : > { %p998_p10 = pnand %p996_p9, %p984_p13  ;;  %p1005_p8 = por %p1004_p4, %p1003_p1 }
  0x25   : > { %p999_p6 = pneg %p998_p10 }
  0x27   : > { %p1006_p2 = pnand %p1005_p8, %p999_p6 }
  0x29   : > { %1009 = shalt.err (!%p1006_p2)
}
  0x2a   : > { %s1129_s10 = smov 128   ;;  %s1130_s11 = smov 8  }
  0x2b   : > { %913 = dma.hbm_to_vmem [thread:$0]  (!%p1221_p11), %s1527_s1, 2048, %s146_s26, [#allocation6], %s1129_s10, %s1129_s10, %s1130_s11  }
  0x2c   : > { %p34_p1 = scmp.ge.s32.totalorder %s32_s28, 2  ;;  %s41_s25 = sadd.s32 1, %s1114_s14 }
  0x2d   : > { %p48_p2 = scmp.ne.s32.totalorder %s1114_s14, %s1110_s13  ;;  %p49_p4 = scmp.eq.s32.totalorder %s1126_s17, 0 }
  0x2e   : > { %s1554_s28 = smov (%p34_p1, %s32_s28), 0  ;;  %p1540_p8 = scmp.ne.s32.totalorder %s1535_s21, 0 }
  0x2f   : > { %p50_p6 = por %p49_p4, %p48_p2  ;;  %s36_s27 = ssub.s32 %s1122_s16, %s1554_s28 }
  0x30   : > { %p1253_p10 = por %p1540_p8, %p48_p2  ;;  %p923_p12 = scmp.lt.s32.totalorder %s1126_s17, 2 }
  0x31   : > { %p39_p13 = scmp.eq.s32.totalorder %s36_s27, 0  ;;  %s162_s30 = sand.u32 1, %s1114_s14  }
  0x32   : > { %s900_s4 = smul.u32 216, %s162_s30  ;;  %p1265_p11 = pnand %p923_p12, %p50_p6 }
  0x33   : > { %s1262_s5 = scalar_select %p39_p13, %s1114_s14, %s41_s25  }
  0x34   : > { %s702_s26 = smul.u32 3456, %s1122_s16  ;;  %s166_s6 = scalar_lea.vmem [#allocation2], %s900_s4 }
  0x35   : > { %s174_s7 = sshll.u32 %s166_s6, 4  ;;  %s1276_s19 = scalar_lea.sflag [#allocation3], %s162_s30  ;;  %s1274_s7 = int_to_ptr.vmem [resolvable:$true] %s174_s7 }
  0x36   : > { %s1272_s18 = scalar_lea.hbm %s1526_s0, %s702_s26  ;;  %p1012_p3 = pneg %p1265_p11 }
  0x37   : > { %s1010_s25 = scalar_lea.hbm %s1272_s18, 3456  ;;  %s1015_s26 = scalar_lea.hbm %s1526_s0, 6912 }
  0x38   : > { %p1011_p0 = scmp.ne.s32.totalorder %s1272_s18, %s1010_s25  ;;  %p1016_p9 = scmp.lt.u32.totalorder %s1272_s18, %s1526_s0 }
  0x39   : > { %p1017_p1 = scmp.lt.u32.totalorder %s1015_s26, %s1010_s25  ;;  %p1019_p4 = scmp.lt.u32.totalorder %s1010_s25, %s1272_s18 }
  0x3a   : > { %p1013_p5 = pnand %p1012_p3, %p1011_p0 }
  0x3b   : > { %p1018_p2 = por %p1017_p1, %p1016_p9 }
  0x3c   : > { %p1014_p7 = pneg %p1013_p5 }
  0x3d   : > { %p1020_p6 = por %p1019_p4, %p1018_p2 }
  0x3f   : > { %p1021_p8 = pnand %p1020_p6, %p1014_p7 }
  0x41   : > { %1024 = shalt.err (!%p1021_p8)
}
  0x42   : > { %s1025_s30 = scalar_lea.vmem %s1274_s7, 3456  ;;  %s1131_s21 = smov [#allocation2]  }
  0x43   : > { %p1026_p12 = scmp.ne.s32.totalorder %s1274_s7, %s1025_s30  ;;  %s1030_s27 = sshll.u32 %s1131_s21, 4  ;;  %s1031_s27 = int_to_ptr.vmem [resolvable:$false] %s1030_s27 }
  0x44   : > { %s1032_s4 = scalar_lea.vmem %s1031_s27, 6912  ;;  %p1033_p5 = scmp.lt.s32.totalorder %s1274_s7, %s1031_s27 }
  0x45   : > { %p1028_p13 = pnand %p1026_p12, %p1012_p3  ;;  %p1034_p9 = scmp.lt.s32.totalorder %s1032_s4, %s1025_s30 }
  0x47   : > { %p1029_p0 = pneg %p1028_p13  ;;  %p1035_p1 = por %p1034_p9, %p1033_p5 }
  0x49   : > { %p1036_p2 = pnand %p1035_p1, %p1029_p0 }
  0x4b   : > { %1039 = shalt.err (!%p1036_p2)
}
  0x4c   : > { %917 = dma.hbm_to_vmem [thread:$0]  (!%p1265_p11), %s1272_s18, 3456, %s1274_s7, %s1276_s19, %s1129_s10, %s1129_s10, %s1130_s11  }
  0x4d   : > { %p1543_p3 = scmp.ne.s32.totalorder %s1538_s24, 0 }
  0x4e   : > { %s1310_s25 = sand.u32 (!%p1543_p3), 1, %s1110_s13   ;;  %p1544_p7 = scmp.ne.s32.totalorder (!%p1543_p3), %s1536_s22, 0 }
  0x4f   : > { %186 = sbr.rel (%p1543_p3) target bundleno = 406 (0x196), region = 32  ;;  %s189_s6 = scalar_lea.sflag (!%p1543_p3), [#allocation3], %s1310_s25 }
  0x50   : > { %s901_s26 = smul.u32 (!%p1543_p3), 216, %s1310_s25 }
  0x52   : > { %s1316_s8 = scalar_lea.vmem (!%p1543_p3), [#allocation2], %s901_s26 }
  0x56   : > { %1093 = dma.done.wait (%p1544_p7), %s189_s6, 3456  }
  0x57   : > { %1095 = vsyncadd (%p1544_p7), %s189_s6, 4294963840  ;;  %p1545_p11 = scmp.ne.s32.totalorder %s1534_s20, 0 }
  0x59   : > { %1097 = dma.done.wait (%p1545_p11), [#allocation6], 2048  }
  0x5a   : > { %1099 = vsyncadd (%p1545_p11), [#allocation6], 4294965248  ;;  %v1132_v0 = vmov 0.0|0.0   ;;  %vm1133_vm0 = vmmov 0   ;;  %v1134_v1 = vmov 0.0   ;;  %v259_v2 = vld [vmem:[#allocation5] sm:$0xff] }
  0x5b   : > { %860 = vmatprep.subr.bf16.mxu0 %v1132_v0  ;;  %884 = vmatprep.subr.bf16.mxu1 %v1132_v0  ;;  %v260_v3 = vld [vmem:[#allocation5 + $0x8] sm:$0xff]  ;;  %v261_v4 = vld [vmem:[#allocation5 + $0x10] sm:$0xff]  ;;  %v262_v6 = vld [vmem:[#allocation5 + $0x18] sm:$0xff]  ;;  %s1416_s24 = scalar_lea.vmem [#allocation7], %s901_s26  ;;  %s703_s10 = smul.u32 3456, %s1118_s15 }
  0x5c   : > { %779 = vmatprep.mubr.msk.f32.mxu0 %vm1133_vm0, %v1134_v1  ;;  %821 = vmatprep.mubr.msk.f32.mxu1 %vm1133_vm0, %v1134_v1  ;;  %v861_v5 = vpack.c.bf16 %v260_v3, %v259_v2  ;;  %v864_v7 = vpack.c.bf16 %v262_v6, %v261_v4  ;;  %v263_v8 = vld [vmem:[#allocation5 + $0x20] sm:$0xff]  ;;  %v264_v9 = vld [vmem:[#allocation5 + $0x28] sm:$0xff]  ;;  %v265_v11 = vld [vmem:[#allocation5 + $0x30] sm:$0xff]  ;;  %s597_s11 = sshll.u32 %s1416_s24, 4  ;;  %s584_s15 = scalar_lea.sflag [#allocation4], %s1310_s25  ;;  %s1475_s11 = int_to_ptr.vmem [resolvable:$true] %s597_s11 }
  0x5d   : > { %v867_v10 = vpack.c.bf16 %v264_v9, %v263_v8  ;;  %v266_v12 = vld [vmem:[#allocation5 + $0x38] sm:$0xff]  ;;  %v267_v14 = vld [vmem:[#allocation5 + $0x40] sm:$0xff]  ;;  %v268_v15 = vld [vmem:[#allocation5 + $0x48] sm:$0xff]  ;;  %s1473_s19 = scalar_lea.hbm %s1529_s3, %s703_s10  ;;  %s1040_s9 = scalar_lea.vmem %s1475_s11, 3456 }
  0x5e   : > { %862 = vmatpush3.bf16.msra.mxu0 %v861_v5  ;;  %892 = vmatpush3.bf16.msra.mxu1 %v861_v5  ;;  %v870_v13 = vpack.c.bf16 %v266_v12, %v265_v11  ;;  %v873_v16 = vpack.c.bf16 %v268_v15, %v267_v14  ;;  %v269_v17 = vld [vmem:[#allocation5 + $0x50] sm:$0xff]  ;;  %v270_v18 = vld [vmem:[#allocation5 + $0x58] sm:$0xff]  ;;  %v271_v20 = vld [vmem:[#allocation5 + $0x60] sm:$0xff]  ;;  %p1041_p4 = scmp.ne.s32.totalorder %s1475_s11, %s1040_s9  ;;  %s1135_s30 = smov [#allocation7]  }
  0x5f   : > { %863 = vmatprep.subr.bf16.mxu0 %v1132_v0  ;;  %885 = vmatprep.subr.bf16.mxu1 %v1132_v0  ;;  %v876_v19 = vpack.c.bf16 %v270_v18, %v269_v17  ;;  %v272_v21 = vld [vmem:[#allocation5 + $0x68] sm:$0xff]  ;;  %v273_v23 = vld [vmem:[#allocation5 + $0x70] sm:$0xff]  ;;  %v274_v24 = vld [vmem:[#allocation5 + $0x78] sm:$0xff]  ;;  %s1044_s21 = sshll.u32 %s1135_s30, 4  ;;  %s1045_s21 = int_to_ptr.vmem [resolvable:$false] %s1044_s21 }
  0x60   : > { %v879_v22 = vpack.c.bf16 %v272_v21, %v271_v20  ;;  %v882_v25 = vpack.c.bf16 %v274_v24, %v273_v23  ;;  %v302_v26 = vld [vmem:[%s1316_s8] sm:$0xff]  ;;  %v316_v27 = vld [vmem:[%s1316_s8 + $0x70] sm:$0xff]  ;;  %v303_v28 = vld [vmem:[%s1316_s8 + $0x8] sm:$0xff]  ;;  %p1042_p6 = pnand %p1041_p4, %p1253_p10  ;;  %s1046_s27 = scalar_lea.vmem %s1045_s21, 6912 }
  0x61   : > { %v317_v29 = vld [vmem:[%s1316_s8 + $0x78] sm:$0xff]  ;;  %v304_v30 = vld [vmem:[%s1316_s8 + $0x10] sm:$0xff]  ;;  %v318_v31 = vld [vmem:[%s1316_s8 + $0x80] sm:$0xff]  ;;  %p1047_p12 = scmp.lt.s32.totalorder %s1475_s11, %s1045_s21  ;;  %p1048_p13 = scmp.lt.s32.totalorder %s1046_s27, %s1040_s9 }
  0x62   : > { %865 = vmatpush3.bf16.msra.mxu0 %v864_v7  ;;  %893 = vmatpush3.bf16.msra.mxu1 %v864_v7  ;;  %v305_v32 = vld [vmem:[%s1316_s8 + $0x18] sm:$0xff]  ;;  %v319_v33 = vld [vmem:[%s1316_s8 + $0x88] sm:$0xff]  ;;  %v306_v34 = vld [vmem:[%s1316_s8 + $0x20] sm:$0xff]  ;;  %p1043_p8 = pneg %p1042_p6 }
  0x63   : > { %866 = vmatprep.subr.bf16.mxu0 %v1132_v0  ;;  %886 = vmatprep.subr.bf16.mxu1 %v1132_v0  ;;  %v320_v35 = vld [vmem:[%s1316_s8 + $0x90] sm:$0xff]  ;;  %v307_v36 = vld [vmem:[%s1316_s8 + $0x28] sm:$0xff]  ;;  %v321_v37 = vld [vmem:[%s1316_s8 + $0x98] sm:$0xff]  ;;  %p1049_p0 = por %p1048_p13, %p1047_p12 }
  0x64   : > { %v308_v38 = vld [vmem:[%s1316_s8 + $0x30] sm:$0xff]  ;;  %v322_v39 = vld [vmem:[%s1316_s8 + $0xa0] sm:$0xff]  ;;  %v309_v40 = vld [vmem:[%s1316_s8 + $0x38] sm:$0xff] }
  0x65   : > { %v323_v41 = vld [vmem:[%s1316_s8 + $0xa8] sm:$0xff]  ;;  %v310_v42 = vld [vmem:[%s1316_s8 + $0x40] sm:$0xff]  ;;  %v324_v43 = vld [vmem:[%s1316_s8 + $0xb0] sm:$0xff]  ;;  %p1050_p5 = pnand %p1049_p0, %p1043_p8 }
  0x66   : > { %868 = vmatpush3.bf16.msra.mxu0 %v867_v10  ;;  %894 = vmatpush3.bf16.msra.mxu1 %v867_v10  ;;  %v311_v44 = vld [vmem:[%s1316_s8 + $0x48] sm:$0xff]  ;;  %v325_v45 = vld [vmem:[%s1316_s8 + $0xb8] sm:$0xff]  ;;  %v312_v46 = vld [vmem:[%s1316_s8 + $0x50] sm:$0xff] }
  0x67   : > { %869 = vmatprep.subr.bf16.mxu0 %v1132_v0  ;;  %887 = vmatprep.subr.bf16.mxu1 %v1132_v0  ;;  %v326_v47 = vld [vmem:[%s1316_s8 + $0xc0] sm:$0xff]  ;;  %v313_v48 = vld [vmem:[%s1316_s8 + $0x58] sm:$0xff]  ;;  %v327_v49 = vld [vmem:[%s1316_s8 + $0xc8] sm:$0xff] }
  0x68   : > { %v314_v50 = vld [vmem:[%s1316_s8 + $0x60] sm:$0xff]  ;;  %v328_v51 = vld [vmem:[%s1316_s8 + $0xd0] sm:$0xff]  ;;  %v315_v52 = vld [vmem:[%s1316_s8 + $0x68] sm:$0xff] }
  0x69   : > { %v1410_v53 = vld [vmem:[%s1528_s2] ss:$0 sm:$0xff] }
  0x6a   : > { %871 = vmatpush3.bf16.msra.mxu0 %v870_v13  ;;  %895 = vmatpush3.bf16.msra.mxu1 %v870_v13 }
  0x6b   : > { %872 = vmatprep.subr.bf16.mxu0 %v1132_v0  ;;  %888 = vmatprep.subr.bf16.mxu1 %v1132_v0 }
  0x6e   : > { %874 = vmatpush3.bf16.msra.mxu0 %v873_v16  ;;  %896 = vmatpush3.bf16.msra.mxu1 %v873_v16 }
  0x6f   : > { %875 = vmatprep.subr.bf16.mxu0 %v1132_v0  ;;  %889 = vmatprep.subr.bf16.mxu1 %v1132_v0 }
  0x72   : > { %877 = vmatpush3.bf16.msra.mxu0 %v876_v19  ;;  %897 = vmatpush3.bf16.msra.mxu1 %v876_v19 }
  0x73   : > { %878 = vmatprep.subr.bf16.mxu0 %v1132_v0  ;;  %890 = vmatprep.subr.bf16.mxu1 %v1132_v0 }
  0x76   : > { %880 = vmatpush3.bf16.msra.mxu0 %v879_v22  ;;  %898 = vmatpush3.bf16.msra.mxu1 %v879_v22 }
  0x77   : > { %881 = vmatprep.subr.bf16.mxu0 %v1132_v0  ;;  %891 = vmatprep.subr.bf16.mxu1 %v1132_v0 }
  0x7a   : > { %883 = vmatpush3.bf16.msra.mxu0 %v882_v25  ;;  %899 = vmatpush3.bf16.msra.mxu1 %v882_v25 }
  0x7d   : > { %780 = vmatmul.mubr.f32.vlgmr.msra.gmra.mrb[0].mxu0 %v302_v26  ;;  %822 = vmatmul.mubr.f32.vlgmr.msra.gmra.mrb[0].mxu1 %v316_v27 }
  0x7e   : > { %782 = vmatprep.mubr.msk.f32.mxu0 %vm1133_vm0, %v1134_v1  ;;  %824 = vmatprep.mubr.msk.f32.mxu1 %vm1133_vm0, %v1134_v1 }
  0x81   : > { %783 = vmatmul.mubr.f32.gmra.mrb[2].mxu0 %v303_v28  ;;  %825 = vmatmul.mubr.f32.gmra.mrb[2].mxu1 %v317_v29 }
  0x82   : > { %785 = vmatprep.mubr.msk.f32.mxu0 %vm1133_vm0, %v1134_v1  ;;  %827 = vmatprep.mubr.msk.f32.mxu1 %vm1133_vm0, %v1134_v1 }
  0x85   : > { %786 = vmatmul.mubr.f32.gmra.mrb[4].mxu0 %v304_v30  ;;  %828 = vmatmul.mubr.f32.gmra.mrb[4].mxu1 %v318_v31 }
  0x86   : > { %788 = vmatprep.mubr.msk.f32.mxu0 %vm1133_vm0, %v1134_v1  ;;  %830 = vmatprep.mubr.msk.f32.mxu1 %vm1133_vm0, %v1134_v1 }
  0x89   : > { %789 = vmatmul.mubr.f32.gmra.mrb[6].mxu0 %v305_v32  ;;  %831 = vmatmul.mubr.f32.gmra.mrb[6].mxu1 %v319_v33 }
  0x8a   : > { %791 = vmatprep.mubr.msk.f32.mxu0 %vm1133_vm0, %v1134_v1  ;;  %833 = vmatprep.mubr.msk.f32.mxu1 %vm1133_vm0, %v1134_v1 }
  0x8d   : > { %792 = vmatmul.mubr.f32.gmra.mrb[8].mxu0 %v306_v34  ;;  %834 = vmatmul.mubr.f32.gmra.mrb[8].mxu1 %v320_v35 }
  0x8e   : > { %794 = vmatprep.mubr.msk.f32.mxu0 %vm1133_vm0, %v1134_v1  ;;  %836 = vmatprep.mubr.msk.f32.mxu1 %vm1133_vm0, %v1134_v1 }
  0x91   : > { %795 = vmatmul.mubr.f32.gmra.mrb[10].mxu0 %v307_v36  ;;  %837 = vmatmul.mubr.f32.gmra.mrb[10].mxu1 %v321_v37 }
  0x92   : > { %797 = vmatprep.mubr.msk.f32.mxu0 %vm1133_vm0, %v1134_v1  ;;  %839 = vmatprep.mubr.msk.f32.mxu1 %vm1133_vm0, %v1134_v1 }
  0x95   : > { %798 = vmatmul.mubr.f32.gmra.mrb[12].mxu0 %v308_v38  ;;  %840 = vmatmul.mubr.f32.gmra.mrb[12].mxu1 %v322_v39 }
  0x96   : > { %800 = vmatprep.mubr.msk.f32.mxu0 %vm1133_vm0, %v1134_v1  ;;  %842 = vmatprep.mubr.msk.f32.mxu1 %vm1133_vm0, %v1134_v1 }
  0x99   : > { %801 = vmatmul.mubr.f32.gmra.mrb[14].mxu0 %v309_v40  ;;  %843 = vmatmul.mubr.f32.gmra.mrb[14].mxu1 %v323_v41 }
  0x9a   : > { %803 = vmatprep.mubr.msk.f32.mxu0 %vm1133_vm0, %v1134_v1  ;;  %845 = vmatprep.mubr.msk.f32.mxu1 %vm1133_vm0, %v1134_v1 }
  0x9d   : > { %804 = vmatmul.mubr.f32.gmra.mrb[16].mxu0 %v310_v42  ;;  %846 = vmatmul.mubr.f32.gmra.mrb[16].mxu1 %v324_v43 }
  0x9e   : > { %806 = vmatprep.mubr.msk.f32.mxu0 %vm1133_vm0, %v1134_v1  ;;  %848 = vmatprep.mubr.msk.f32.mxu1 %vm1133_vm0, %v1134_v1 }
  0xa1   : > { %807 = vmatmul.mubr.f32.gmra.mrb[18].mxu0 %v311_v44  ;;  %849 = vmatmul.mubr.f32.gmra.mrb[18].mxu1 %v325_v45 }
  0xa2   : > { %809 = vmatprep.mubr.msk.f32.mxu0 %vm1133_vm0, %v1134_v1  ;;  %851 = vmatprep.mubr.msk.f32.mxu1 %vm1133_vm0, %v1134_v1 }
  0xa5   : > { %810 = vmatmul.mubr.f32.gmra.mrb[20].mxu0 %v312_v46  ;;  %852 = vmatmul.mubr.f32.gmra.mrb[20].mxu1 %v326_v47 }
  0xa6   : > { %812 = vmatprep.mubr.msk.f32.mxu0 %vm1133_vm0, %v1134_v1  ;;  %854 = vmatprep.mubr.msk.f32.mxu1 %vm1133_vm0, %v1134_v1 }
  0xa9   : > { %813 = vmatmul.mubr.f32.gmra.mrb[22].mxu0 %v313_v48  ;;  %855 = vmatmul.mubr.f32.gmra.mrb[22].mxu1 %v327_v49 }
  0xaa   : > { %815 = vmatprep.mubr.msk.f32.mxu0 %vm1133_vm0, %v1134_v1  ;;  %857 = vmatprep.mubr.msk.f32.mxu1 %vm1133_vm0, %v1134_v1 }
  0xad   : > { %816 = vmatmul.mubr.f32.gmra.mrb[24].mxu0 %v314_v50  ;;  %858 = vmatmul.mubr.f32.gmra.mrb[24].mxu1 %v328_v51 }
  0xae   : > { %818 = vmatprep.mubr.msk.f32.mxu0 %vm1133_vm0, %v1134_v1 }
  0xb1   : > { %819 = vmatmul.mubr.f32.gmra.mrb[26].mxu0 %v315_v52 }
 0x150   : > { %v395_v54 = vpop.f32.mrb[0].mxu0  ;;  %v465_v55 = vpop.f32.mrb[0].mxu1 }
 0x151   : > { %v529_v56 = vadd.f32 %v1410_v53, %v395_v54  ;;  %v781_v57 = vpop.f32.mrb[1].mxu0  ;;  %v543_v58 = vadd.f32 %v1410_v53, %v465_v55  ;;  %v823_v59 = vpop.f32.mrb[1].mxu1 }
 0x153   : > { %556 = vst [vmem:[%s1416_s24] sm:$0xff] %v529_v56  ;;  %570 = vst [vmem:[%s1416_s24 + $0x70] sm:$0xff] %v543_v58 }
 0x154   : > { %v400_v60 = vpop.f32.mrb[2].mxu0  ;;  %v470_v61 = vpop.f32.mrb[2].mxu1 }
 0x155   : > { %v530_v62 = vadd.f32 %v1410_v53, %v400_v60  ;;  %v784_v63 = vpop.f32.mrb[3].mxu0  ;;  %v544_v0 = vadd.f32 %v1410_v53, %v470_v61  ;;  %v826_v1 = vpop.f32.mrb[3].mxu1 }
 0x157   : > { %557 = vst [vmem:[%s1416_s24 + $0x8] sm:$0xff] %v530_v62  ;;  %571 = vst [vmem:[%s1416_s24 + $0x78] sm:$0xff] %v544_v0 }
 0x158   : > { %v405_v2 = vpop.f32.mrb[4].mxu0  ;;  %v475_v3 = vpop.f32.mrb[4].mxu1 }
 0x159   : > { %v531_v4 = vadd.f32 %v1410_v53, %v405_v2  ;;  %v787_v5 = vpop.f32.mrb[5].mxu0  ;;  %v545_v6 = vadd.f32 %v1410_v53, %v475_v3  ;;  %v829_v7 = vpop.f32.mrb[5].mxu1 }
 0x15b   : > { %558 = vst [vmem:[%s1416_s24 + $0x10] sm:$0xff] %v531_v4  ;;  %572 = vst [vmem:[%s1416_s24 + $0x80] sm:$0xff] %v545_v6 }
 0x15c   : > { %v410_v8 = vpop.f32.mrb[6].mxu0  ;;  %v480_v9 = vpop.f32.mrb[6].mxu1 }
 0x15d   : > { %v532_v10 = vadd.f32 %v1410_v53, %v410_v8  ;;  %v790_v11 = vpop.f32.mrb[7].mxu0  ;;  %v546_v12 = vadd.f32 %v1410_v53, %v480_v9  ;;  %v832_v13 = vpop.f32.mrb[7].mxu1 }
 0x15f   : > { %559 = vst [vmem:[%s1416_s24 + $0x18] sm:$0xff] %v532_v10  ;;  %573 = vst [vmem:[%s1416_s24 + $0x88] sm:$0xff] %v546_v12 }
 0x160   : > { %v415_v14 = vpop.f32.mrb[8].mxu0  ;;  %v485_v15 = vpop.f32.mrb[8].mxu1 }
 0x161   : > { %v533_v16 = vadd.f32 %v1410_v53, %v415_v14  ;;  %v793_v17 = vpop.f32.mrb[9].mxu0  ;;  %v547_v18 = vadd.f32 %v1410_v53, %v485_v15  ;;  %v835_v19 = vpop.f32.mrb[9].mxu1 }
 0x163   : > { %560 = vst [vmem:[%s1416_s24 + $0x20] sm:$0xff] %v533_v16  ;;  %574 = vst [vmem:[%s1416_s24 + $0x90] sm:$0xff] %v547_v18 }
 0x164   : > { %v420_v20 = vpop.f32.mrb[10].mxu0  ;;  %v490_v21 = vpop.f32.mrb[10].mxu1 }
 0x165   : > { %v534_v22 = vadd.f32 %v1410_v53, %v420_v20  ;;  %v796_v23 = vpop.f32.mrb[11].mxu0  ;;  %v548_v24 = vadd.f32 %v1410_v53, %v490_v21  ;;  %v838_v25 = vpop.f32.mrb[11].mxu1 }
 0x167   : > { %561 = vst [vmem:[%s1416_s24 + $0x28] sm:$0xff] %v534_v22  ;;  %575 = vst [vmem:[%s1416_s24 + $0x98] sm:$0xff] %v548_v24 }
 0x168   : > { %v425_v26 = vpop.f32.mrb[12].mxu0  ;;  %v495_v27 = vpop.f32.mrb[12].mxu1 }
 0x169   : > { %v535_v28 = vadd.f32 %v1410_v53, %v425_v26  ;;  %v799_v29 = vpop.f32.mrb[13].mxu0  ;;  %v549_v30 = vadd.f32 %v1410_v53, %v495_v27  ;;  %v841_v31 = vpop.f32.mrb[13].mxu1 }
 0x16b   : > { %562 = vst [vmem:[%s1416_s24 + $0x30] sm:$0xff] %v535_v28  ;;  %576 = vst [vmem:[%s1416_s24 + $0xa0] sm:$0xff] %v549_v30 }
 0x16c   : > { %v430_v32 = vpop.f32.mrb[14].mxu0  ;;  %v500_v33 = vpop.f32.mrb[14].mxu1 }
 0x16d   : > { %v536_v34 = vadd.f32 %v1410_v53, %v430_v32  ;;  %v802_v35 = vpop.f32.mrb[15].mxu0  ;;  %v550_v36 = vadd.f32 %v1410_v53, %v500_v33  ;;  %v844_v37 = vpop.f32.mrb[15].mxu1 }
 0x16f   : > { %563 = vst [vmem:[%s1416_s24 + $0x38] sm:$0xff] %v536_v34  ;;  %577 = vst [vmem:[%s1416_s24 + $0xa8] sm:$0xff] %v550_v36 }
 0x170   : > { %v435_v38 = vpop.f32.mrb[16].mxu0  ;;  %v505_v39 = vpop.f32.mrb[16].mxu1 }
 0x171   : > { %v537_v40 = vadd.f32 %v1410_v53, %v435_v38  ;;  %v805_v41 = vpop.f32.mrb[17].mxu0  ;;  %v551_v42 = vadd.f32 %v1410_v53, %v505_v39  ;;  %v847_v43 = vpop.f32.mrb[17].mxu1 }
 0x173   : > { %564 = vst [vmem:[%s1416_s24 + $0x40] sm:$0xff] %v537_v40  ;;  %578 = vst [vmem:[%s1416_s24 + $0xb0] sm:$0xff] %v551_v42 }
 0x174   : > { %v440_v44 = vpop.f32.mrb[18].mxu0  ;;  %v510_v45 = vpop.f32.mrb[18].mxu1 }
 0x175   : > { %v538_v46 = vadd.f32 %v1410_v53, %v440_v44  ;;  %v808_v47 = vpop.f32.mrb[19].mxu0  ;;  %v552_v48 = vadd.f32 %v1410_v53, %v510_v45  ;;  %v850_v49 = vpop.f32.mrb[19].mxu1 }
 0x177   : > { %565 = vst [vmem:[%s1416_s24 + $0x48] sm:$0xff] %v538_v46  ;;  %579 = vst [vmem:[%s1416_s24 + $0xb8] sm:$0xff] %v552_v48 }
 0x178   : > { %v445_v50 = vpop.f32.mrb[20].mxu0  ;;  %v515_v51 = vpop.f32.mrb[20].mxu1 }
 0x179   : > { %v539_v52 = vadd.f32 %v1410_v53, %v445_v50  ;;  %v811_v54 = vpop.f32.mrb[21].mxu0  ;;  %v553_v55 = vadd.f32 %v1410_v53, %v515_v51  ;;  %v853_v56 = vpop.f32.mrb[21].mxu1 }
 0x17b   : > { %566 = vst [vmem:[%s1416_s24 + $0x50] sm:$0xff] %v539_v52  ;;  %580 = vst [vmem:[%s1416_s24 + $0xc0] sm:$0xff] %v553_v55 }
 0x17c   : > { %v450_v57 = vpop.f32.mrb[22].mxu0  ;;  %v520_v58 = vpop.f32.mrb[22].mxu1 }
 0x17d   : > { %v540_v59 = vadd.f32 %v1410_v53, %v450_v57  ;;  %v814_v60 = vpop.f32.mrb[23].mxu0  ;;  %v554_v61 = vadd.f32 %v1410_v53, %v520_v58  ;;  %v856_v62 = vpop.f32.mrb[23].mxu1 }
 0x17f   : > { %567 = vst [vmem:[%s1416_s24 + $0x58] sm:$0xff] %v540_v59  ;;  %581 = vst [vmem:[%s1416_s24 + $0xc8] sm:$0xff] %v554_v61 }
 0x180   : > { %v455_v63 = vpop.f32.mrb[24].mxu0  ;;  %v525_v0 = vpop.f32.mrb[24].mxu1 }
 0x181   : > { %v541_v1 = vadd.f32 %v1410_v53, %v455_v63  ;;  %v817_v2 = vpop.f32.mrb[25].mxu0  ;;  %v555_v3 = vadd.f32 %v1410_v53, %v525_v0  ;;  %v859_v4 = vpop.f32.mrb[25].mxu1 }
 0x183   : > { %568 = vst [vmem:[%s1416_s24 + $0x60] sm:$0xff] %v541_v1  ;;  %582 = vst [vmem:[%s1416_s24 + $0xd0] sm:$0xff] %v555_v3 }
 0x184   : > { %v460_v5 = vpop.f32.mrb[26].mxu0 }
 0x185   : > { %v542_v6 = vadd.f32 %v1410_v53, %v460_v5  ;;  %v820_v7 = vpop.f32.mrb[27].mxu0 }
 0x187   : > { %569 = vst [vmem:[%s1416_s24 + $0x68] sm:$0xff] %v542_v6 }
 0x188   : > { %1053 = shalt.err (!%p1050_p5)
}
 0x189   : > { %s1054_s4 = scalar_lea.hbm %s1473_s19, 3456  ;;  %s1058_s8 = scalar_lea.hbm %s1529_s3, 6912 }
 0x18a   : > { %p1055_p9 = scmp.ne.s32.totalorder %s1473_s19, %s1054_s4  ;;  %p1059_p3 = scmp.lt.u32.totalorder %s1473_s19, %s1529_s3 }
 0x18b   : > { %p1060_p7 = scmp.lt.u32.totalorder %s1058_s8, %s1054_s4  ;;  %p1062_p4 = scmp.lt.u32.totalorder %s1054_s4, %s1473_s19 }
 0x18c   : > { %p1056_p1 = pnand %p1055_p9, %p1253_p10 }
 0x18d   : > { %p1061_p11 = por %p1060_p7, %p1059_p3 }
 0x18e   : > { %p1057_p2 = pneg %p1056_p1 }
 0x18f   : > { %p1063_p6 = por %p1062_p4, %p1061_p11 }
 0x191   : > { %p1064_p8 = pnand %p1063_p6, %p1057_p2 }
 0x193   : > { %1067 = shalt.err (!%p1064_p8)
}
 0x194   : > { %s1136_s24 = smov 128   ;;  %s1137_s10 = smov 8  }
 0x195   : > { %908 = dma.vmem_to_hbm [thread:$0]  (%p1253_p10), %s1475_s11, 3456, %s1473_s19, %s584_s15, %s1136_s24, %s1136_s24, %s1137_s10  }
 0x196 PF: > { %s612_s7 = sand.u32 1, %s1106_s12   ;;  %p1546_p12 = scmp.ne.s32.totalorder %s1537_s23, 0 }
 0x197   : > { %p1547_p13 = scmp.ge.s32.totalorder %s1126_s17, 2  ;;  %s613_s18 = scalar_lea.sflag [#allocation4], %s612_s7 }
 0x199   : > { %p919_p0 = pnand %p1547_p13, %p1546_p12 }
 0x19b   : > { %1101 = dma.done.wait (!%p919_p0), %s613_s18, 3456  }
 0x19c   : > { %1103 = vsyncadd (!%p919_p0), %s613_s18, 4294963840  ;;  %s20_s17 = sadd.s32 1, %s1126_s17   ;;  %s1548_s12 = smov %s1110_s13 }
 0x19d   : > { %p17_p5 = scmp.ge.s32.totalorder %s20_s17, 4   ;;  %s1549_s13 = smov %s1114_s14 }
 0x19e   : > { %s1550_s14 = smov %s1262_s5  ;;  %s1551_s15 = smov %s1122_s16 }
 0x19f   : > { %s1552_s16 = smov %s1554_s28  ;;  %19 = sbr.rel (!%p17_p5) target bundleno = 7 (0x7), region = 85 }
 0x1a6   :  { %618 = vsyncpa [#allocation3], 1 }
 0x1a7   :  { %620 = vsyncpa [#allocation3 + $0x1], 1 }
 0x1a8   :  { %621 = vsyncpa [#allocation6], 1 }
 0x1a9   :  { %622 = vsyncpa [#allocation4], 1 }
 0x1aa   :  { %624 = vsyncpa [#allocation4 + $0x1], 1 }

</bundles_post_ra>
